<compile_context>
chip_gen: v7x
topology: tpu7x:2x2x1
jax: 0.10.0
libtpu: 0.0.40
codegen_flags: <defaults>
</compile_context>

<pallas_src>
import jax
import jax.numpy as jnp
from jax.experimental import pallas as pl
from jax.experimental.pallas import tpu as pltpu


def classifier_kernel(x_ref, w1_ref, b1_ref, w2_ref, b2_ref, w3_ref, b3_ref,
                      out_ref):
    """One batch tile: Linear(2->8)+ReLU, Linear(8->16)+ReLU, Linear(16->4)."""
    x = x_ref[...]                      # (TILE_B, 2) float32

    # fc1 + ReLU: two broadcast-FMAs on the VPU (K=2 is too small for the MXU).
    w1 = w1_ref[...]                    # (2, 8)
    h1 = x[:, 0:1] * w1[0:1, :] + x[:, 1:2] * w1[1:2, :] + b1_ref[...]
    h1 = jnp.maximum(h1, 0.0)

    # fc2 + ReLU (MXU, f32 accumulation).
    h2 = jnp.dot(h1, w2_ref[...], preferred_element_type=jnp.float32)
    h2 = jnp.maximum(h2 + b2_ref[...], 0.0)

    # fc3 (logits, no activation).
    h3 = jnp.dot(h2, w3_ref[...], preferred_element_type=jnp.float32)
    out_ref[...] = (h3 + b3_ref[...]).astype(out_ref.dtype)


def _round_up(n, m):
    return ((n + m - 1) // m) * m


def classifier_forward(x, params, *, tile_b=4096):
    """x: (B, 2) f32; params: w1,b1,w2,b2,w3,b3 in (in,out)/(1,out) layout.

    Grids over the batch dimension so arbitrarily large B streams through VMEM
    with double-buffered pipelining; the tiny weights/biases use constant
    index_maps so they stay VMEM-resident across all grid steps.
    """
    B = x.shape[0]

    # Tile choice: every (tile_b, <=16) f32 buffer is lane-padded to 128 lanes
    # in VMEM (~512 B/row), so tile_b=4096 keeps the double-buffered x/out
    # blocks plus intermediates well under ~20 MiB of scoped VMEM on all of
    # v5e/v6e/v7x while amortizing the ~0.35 us per-grid-step overhead.
    tile_b = max(8, min(int(tile_b), _round_up(B, 8)))
    tile_b = _round_up(tile_b, 8)       # sublane (8) alignment of the block

    b_pad = _round_up(B, tile_b)
    if b_pad != B:
        x = jnp.pad(x, ((0, b_pad - B), (0, 0)))

    grid = (b_pad // tile_b,)

    # NOTE: output last dim is 4 (<128 lanes) -> masked vst.msk stores, but the
    # store count is identical to a lane-dense layout and keeping the exact
    # (B, 4) logits layout avoids inflating HBM write traffic 32x with lane
    # padding (the kernel is HBM-bound, so bytes written dominate).
    flops_per_row = 2 * (2 * 8 + 8 * 16 + 16 * 4)
    bytes_per_row = (2 + 4) * 4
    weight_bytes = 4 * (2 * 8 + 8 + 8 * 16 + 16 + 16 * 4 + 4)
    cost = pl.CostEstimate(
        flops=b_pad * flops_per_row,
        transcendentals=0,
        bytes_accessed=b_pad * bytes_per_row + weight_bytes,
    )

    out = pl.pallas_call(
        classifier_kernel,
        out_shape=jax.ShapeDtypeStruct((b_pad, 4), jnp.float32),
        grid=grid,
        in_specs=[
            pl.BlockSpec((tile_b, 2), lambda i: (i, 0)),   # x: streamed per tile
            pl.BlockSpec((2, 8), lambda i: (0, 0)),        # w1 (VMEM-resident)
            pl.BlockSpec((1, 8), lambda i: (0, 0)),        # b1
            pl.BlockSpec((8, 16), lambda i: (0, 0)),       # w2
            pl.BlockSpec((1, 16), lambda i: (0, 0)),       # b2
            pl.BlockSpec((16, 4), lambda i: (0, 0)),       # w3
            pl.BlockSpec((1, 4), lambda i: (0, 0)),        # b3
        ],
        out_specs=pl.BlockSpec((tile_b, 4), lambda i: (i, 0)),
        compiler_params=pltpu.CompilerParams(
            # Batch tiles are independent: lets v7x shard grid steps across its
            # 2 TensorCores; harmless on single-TC v5e/v6e.
            dimension_semantics=("parallel",),
            # Above v5e's 16 MiB scoped default, below v7x's 64 MiB physical.
            vmem_limit_bytes=48 * 1024 * 1024,
        ),
        cost_estimate=cost,
    )(x, params["w1"], params["b1"],
      params["w2"], params["b2"],
      params["w3"], params["b3"])

    return out[:B]


def init_params(key):
    """Deterministic init mimicking PyTorch Linear default (uniform ±1/sqrt(fan_in)).

    Weights are stored transposed relative to PyTorch: (in_features, out_features).
    """
    dims = [(2, 8), (8, 16), (16, 4)]
    params = {}
    keys = jax.random.split(key, 2 * len(dims))
    for i, (fin, fout) in enumerate(dims):
        bound = 1.0 / jnp.sqrt(jnp.float32(fin))
        w = jax.random.uniform(keys[2 * i], (fin, fout), jnp.float32,
                               minval=-bound, maxval=bound)
        b = jax.random.uniform(keys[2 * i + 1], (1, fout), jnp.float32,
                               minval=-bound, maxval=bound)
        params[f"w{i + 1}"] = w
        params[f"b{i + 1}"] = b
    return params


def reference_forward(x, params):
    h = jnp.maximum(x @ params["w1"] + params["b1"], 0.0)
    h = jnp.maximum(h @ params["w2"] + params["b2"], 0.0)
    return h @ params["w3"] + params["b3"]


if __name__ == "__main__":
    key = jax.random.PRNGKey(0)
    pkey, xkey = jax.random.split(key)
    params = init_params(pkey)

    # Small demo batch of 2-feature inputs (fc1 in_features=2). B=1000 is not a
    # multiple of the small tile, so both padding and a multi-step grid are
    # exercised.
    B = 1000
    x = jax.random.normal(xkey, (B, 2), dtype=jnp.float32)
    ref = reference_forward(x, params)

    # Multi-step grid path (4 grid steps of 256 rows, 24 padded rows).
    out = jax.block_until_ready(classifier_forward(x, params, tile_b=256))
    assert out.shape == (B, 4)
    assert jnp.allclose(out, ref, atol=1e-5, rtol=1e-5)

    # Default large-tile path (single grid step at this small B).
    out2 = jax.block_until_ready(classifier_forward(x, params))
    assert jnp.allclose(out2, ref, atol=1e-5, rtol=1e-5)

    print("KERNEL_OK")
</pallas_src>

<mosaic_0001>
module attributes {stable_mosaic.version = 11 : i64} {
  func.func @classifier_kernel(%arg0: i32, %arg1: memref<256x2xf32, #tpu.memory_space<vmem>>, %arg2: memref<2x8xf32, #tpu.memory_space<vmem>>, %arg3: memref<1x8xf32, #tpu.memory_space<vmem>>, %arg4: memref<8x16xf32, #tpu.memory_space<vmem>>, %arg5: memref<1x16xf32, #tpu.memory_space<vmem>>, %arg6: memref<16x4xf32, #tpu.memory_space<vmem>>, %arg7: memref<1x4xf32, #tpu.memory_space<vmem>>, %arg8: memref<256x4xf32, #tpu.memory_space<vmem>>) attributes {dimension_semantics = [#tpu.dimension_semantics<parallel>], iteration_bounds = array<i64: 4>, scalar_prefetch = 0 : i64, scratch_operands = 0 : i64, tpu.core_type = #tpu.core_type<tc>, window_params = [{transform_indices = @transform_0, window_bounds = array<i64: 256, 2>}, {pipeline_mode = #tpu.pipeline_mode<synchronous>, transform_indices = @transform_1, window_bounds = array<i64: 2, 8>}, {pipeline_mode = #tpu.pipeline_mode<synchronous>, transform_indices = @transform_2, window_bounds = array<i64: 1, 8>}, {pipeline_mode = #tpu.pipeline_mode<synchronous>, transform_indices = @transform_3, window_bounds = array<i64: 8, 16>}, {pipeline_mode = #tpu.pipeline_mode<synchronous>, transform_indices = @transform_4, window_bounds = array<i64: 1, 16>}, {pipeline_mode = #tpu.pipeline_mode<synchronous>, transform_indices = @transform_5, window_bounds = array<i64: 16, 4>}, {pipeline_mode = #tpu.pipeline_mode<synchronous>, transform_indices = @transform_6, window_bounds = array<i64: 1, 4>}, {transform_indices = @transform_7, window_bounds = array<i64: 256, 4>}]} {
    %c0 = arith.constant 0 : index
    %c0_0 = arith.constant 0 : index
    %0 = vector.load %arg1[%c0, %c0_0] : memref<256x2xf32, #tpu.memory_space<vmem>>, vector<256x2xf32>
    %c0_1 = arith.constant 0 : index
    %c0_2 = arith.constant 0 : index
    %1 = vector.load %arg2[%c0_1, %c0_2] : memref<2x8xf32, #tpu.memory_space<vmem>>, vector<2x8xf32>
    %2 = vector.extract_strided_slice %0 {offsets = [0, 0], sizes = [256, 1], strides = [1, 1]} : vector<256x2xf32> to vector<256x1xf32>
    %3 = vector.extract_strided_slice %1 {offsets = [0, 0], sizes = [1, 8], strides = [1, 1]} : vector<2x8xf32> to vector<1x8xf32>
    %4 = vector.broadcast %2 : vector<256x1xf32> to vector<256x8xf32>
    %5 = vector.broadcast %3 : vector<1x8xf32> to vector<256x8xf32>
    %6 = arith.mulf %4, %5 : vector<256x8xf32>
    %7 = vector.extract_strided_slice %0 {offsets = [0, 1], sizes = [256, 1], strides = [1, 1]} : vector<256x2xf32> to vector<256x1xf32>
    %8 = vector.extract_strided_slice %1 {offsets = [1, 0], sizes = [1, 8], strides = [1, 1]} : vector<2x8xf32> to vector<1x8xf32>
    %9 = vector.broadcast %7 : vector<256x1xf32> to vector<256x8xf32>
    %10 = vector.broadcast %8 : vector<1x8xf32> to vector<256x8xf32>
    %11 = arith.mulf %9, %10 : vector<256x8xf32>
    %12 = arith.addf %6, %11 : vector<256x8xf32>
    %c0_3 = arith.constant 0 : index
    %c0_4 = arith.constant 0 : index
    %13 = vector.load %arg3[%c0_3, %c0_4] : memref<1x8xf32, #tpu.memory_space<vmem>>, vector<1x8xf32>
    %14 = vector.broadcast %13 : vector<1x8xf32> to vector<256x8xf32>
    %15 = arith.addf %12, %14 : vector<256x8xf32>
    %cst = arith.constant 0.000000e+00 : f32
    %16 = vector.broadcast %cst : f32 to vector<256x8xf32>
    %17 = arith.maximumf %15, %16 : vector<256x8xf32>
    %c0_5 = arith.constant 0 : index
    %c0_6 = arith.constant 0 : index
    %18 = vector.load %arg4[%c0_5, %c0_6] : memref<8x16xf32, #tpu.memory_space<vmem>>, vector<8x16xf32>
    %cst_7 = arith.constant dense<0.000000e+00> : vector<256x16xf32>
    %19 = tpu.matmul %17, %18, %cst_7 {dimension_numbers = #tpu.dot_dimension_numbers<[1], [0], [0], [1], [0, 0, 1, 1], [], []>} : vector<256x8xf32>, vector<8x16xf32>, vector<256x16xf32> -> vector<256x16xf32>
    %c0_8 = arith.constant 0 : index
    %c0_9 = arith.constant 0 : index
    %20 = vector.load %arg5[%c0_8, %c0_9] : memref<1x16xf32, #tpu.memory_space<vmem>>, vector<1x16xf32>
    %21 = vector.broadcast %20 : vector<1x16xf32> to vector<256x16xf32>
    %22 = arith.addf %19, %21 : vector<256x16xf32>
    %cst_10 = arith.constant 0.000000e+00 : f32
    %23 = vector.broadcast %cst_10 : f32 to vector<256x16xf32>
    %24 = arith.maximumf %22, %23 : vector<256x16xf32>
    %c0_11 = arith.constant 0 : index
    %c0_12 = arith.constant 0 : index
    %25 = vector.load %arg6[%c0_11, %c0_12] : memref<16x4xf32, #tpu.memory_space<vmem>>, vector<16x4xf32>
    %cst_13 = arith.constant dense<0.000000e+00> : vector<256x4xf32>
    %26 = tpu.matmul %24, %25, %cst_13 {dimension_numbers = #tpu.dot_dimension_numbers<[1], [0], [0], [1], [0, 0, 1, 1], [], []>} : vector<256x16xf32>, vector<16x4xf32>, vector<256x4xf32> -> vector<256x4xf32>
    %c0_14 = arith.constant 0 : index
    %c0_15 = arith.constant 0 : index
    %27 = vector.load %arg7[%c0_14, %c0_15] : memref<1x4xf32, #tpu.memory_space<vmem>>, vector<1x4xf32>
    %28 = vector.broadcast %27 : vector<1x4xf32> to vector<256x4xf32>
    %29 = arith.addf %26, %28 : vector<256x4xf32>
    %c0_16 = arith.constant 0 : index
    %c0_17 = arith.constant 0 : index
    %30 = vector.load %arg8[%c0_16, %c0_17] : memref<256x4xf32, #tpu.memory_space<vmem>>, vector<256x4xf32>
    tpu.vector_store %arg8[%c0_16, %c0_17], %29 {strides = array<i32>} : memref<256x4xf32, #tpu.memory_space<vmem>>, vector<256x4xf32>,
    return
  }
  func.func @transform_0(%arg0: i32) -> (i32, i32) {
    %c0_i32 = arith.constant 0 : i32
    %c0_i32_0 = arith.constant 0 : i32
    return %arg0, %c0_i32 : i32, i32
  }
  func.func @transform_1(%arg0: i32) -> (i32, i32) {
    %c0_i32 = arith.constant 0 : i32
    %c0_i32_0 = arith.constant 0 : i32
    %c0_i32_1 = arith.constant 0 : i32
    return %c0_i32, %c0_i32_0 : i32, i32
  }
  func.func @transform_2(%arg0: i32) -> (i32, i32) {
    %c0_i32 = arith.constant 0 : i32
    %c0_i32_0 = arith.constant 0 : i32
    %c0_i32_1 = arith.constant 0 : i32
    return %c0_i32, %c0_i32_0 : i32, i32
  }
  func.func @transform_3(%arg0: i32) -> (i32, i32) {
    %c0_i32 = arith.constant 0 : i32
    %c0_i32_0 = arith.constant 0 : i32
    %c0_i32_1 = arith.constant 0 : i32
    return %c0_i32, %c0_i32_0 : i32, i32
  }
  func.func @transform_4(%arg0: i32) -> (i32, i32) {
    %c0_i32 = arith.constant 0 : i32
    %c0_i32_0 = arith.constant 0 : i32
    %c0_i32_1 = arith.constant 0 : i32
    return %c0_i32, %c0_i32_0 : i32, i32
  }
  func.func @transform_5(%arg0: i32) -> (i32, i32) {
    %c0_i32 = arith.constant 0 : i32
    %c0_i32_0 = arith.constant 0 : i32
    %c0_i32_1 = arith.constant 0 : i32
    return %c0_i32, %c0_i32_0 : i32, i32
  }
  func.func @transform_6(%arg0: i32) -> (i32, i32) {
    %c0_i32 = arith.constant 0 : i32
    %c0_i32_0 = arith.constant 0 : i32
    %c0_i32_1 = arith.constant 0 : i32
    return %c0_i32, %c0_i32_0 : i32, i32
  }
  func.func @transform_7(%arg0: i32) -> (i32, i32) {
    %c0_i32 = arith.constant 0 : i32
    %c0_i32_0 = arith.constant 0 : i32
    return %arg0, %c0_i32 : i32, i32
  }
}

</mosaic_0001>

<bundles_post_ra>
// kernel: tpu_custom_call.1
= control target key start
LH: loop header
LB: loop body
LE: loop exit
PB: predicated region body
PF: predicated region fallthrough
CT: control target
= control target key end

     0   :  { %s1876_s24 = smov 0   ;;  %s2255_s0 = inlined_call_operand.vmem [shape: f32[1024,2], index: 0, kind: input, shape index: {}]   ;;  %s2256_s1 = inlined_call_operand.vmem [shape: f32[2,8], index: 1, kind: input, shape index: {}]   ;;  %s2257_s2 = inlined_call_operand.vmem [shape: f32[1,8], index: 2, kind: input, shape index: {}]   ;;  %s2258_s3 = inlined_call_operand.vmem [shape: f32[8,16], index: 3, kind: input, shape index: {}]   ;;  %s2259_s4 = inlined_call_operand.vmem [shape: f32[1,16], index: 4, kind: input, shape index: {}]   ;;  %s2260_s5 = inlined_call_operand.vmem [shape: f32[16,4], index: 5, kind: input, shape index: {}]   ;;  %s2261_s6 = inlined_call_operand.vmem [shape: f32[1,4], index: 6, kind: input, shape index: {}]   ;;  %s2262_s7 = inlined_call_operand.vmem [shape: f32[1024,4], index: 7, kind: output, shape index: {}]  }
   0x1 LB: > { %s1560_s25 = sadd.s32 4294967295, %s1832_s24   ;;  %p1564_p0 = scmp.ge.s32.totalorder %s1832_s24, 1  ;;  %s1832_s24 = sphi %s1876_s24, %s17_s24  }
   0x2   : > { %p238_p1 = scmp.lt.s32.totalorder %s1832_s24, 5 }
   0x4   : > { %p239_p2 = pnand %p1564_p0, %p238_p1 }
   0x5   : > { %s1565_s26 = sshll.u32 (!%p239_p2), %s1560_s25, 5  ;;  %v1834_v0 = vmov (!%p239_p2), 0   ;;  %v1835_v3 = vmov (!%p239_p2), 1   ;;  %v778_v6 = vld [vmem:[%s2258_s3] sm:$0xff] (!%p239_p2)  ;;  %v475_v33 = vlaneseq (!%p239_p2)  ;;  %vm786_vm0 = vcmask (!%p239_p2), 64512  }
   0x6   : > { %242 = sbr.rel (%p239_p2) target bundleno = 713 (0x2c9), region = 48  ;;  %1823 = vset.pattern.permute.xlu1 (!%p239_p2), %v1834_v0  ;;  %1821 = vset.pattern.permute.xlu0 (!%p239_p2), %v1834_v0  ;;  %p271_p3 = scmp.lt.s32.totalorder (!%p239_p2), %s1565_s26, 127  ;;  %v314_v39 = vld [vmem:[%s2256_s1] sm:$0x3] (!%p239_p2)  ;;  %vm1149_vm1 = vcmask (!%p239_p2), 130048   ;;  %vm1471_vm2 = vcmask (!%p239_p2), 31744  }
   0x7   : > { %1705 = vmatprep.subr.mxu0 (!%p239_p2), %v778_v6  ;;  %v476_v35 = vshrl.u32 (!%p239_p2), %v475_v33, 7  ;;  %v1943_v50 = vld [vmem:[%s2257_s2] ss:$0 sm:$0xff] (!%p239_p2) }
   0x8   : > { %1706 = vmatpush3.msra.mxu0 (!%p239_p2), %v778_v6 }
   0x9   : > { %v477_v37 = vsub.s32 (!%p239_p2), 0, %v476_v35  ;;  %v641_v38 = vsub.s32 (!%p239_p2), 1, %v476_v35 }
   0xb   : > { %v1932_v42 = vrot.slane (!%p239_p2), %v314_v39, %v477_v37  ;;  %v1934_v43 = vrot.slane (!%p239_p2), %v314_v39, %v641_v38 }
   0xd   : > { %s2264_s26 = smov (!%p271_p3, %s1565_s26), 127 }
   0xe   : > { %s1566_s27 = sshll.u32 %s2264_s26, 3 }
   0xf   : > { %s1892_s30 = scalar_lea.vmem %s2255_s0, %s1566_s27  ;;  %s2154_s25 = scalar_lea.vmem %s2262_s7, %s1566_s27 }
  0x10   : > { %v283_v1 = vld [vmem:[%s1892_s30 + $0x8] sm:$0xff]  ;;  %v282_v2 = vld [vmem:[%s1892_s30] sm:$0xff]  ;;  %v284_v4 = vld [vmem:[%s1892_s30 + $0x10] sm:$0xff] }
  0x11   : > { %322 = vperm.xlu1 %1823, %v283_v1   ;;  %317 = vperm.xlu0 %1821, %v282_v2   ;;  %v285_v5 = vld [vmem:[%s1892_s30 + $0x18] sm:$0xff]  ;;  %v286_v7 = vld [vmem:[%s1892_s30 + $0x20] sm:$0xff]  ;;  %v287_v8 = vld [vmem:[%s1892_s30 + $0x28] sm:$0xff] }
  0x12   : > { %v288_v9 = vld [vmem:[%s1892_s30 + $0x30] sm:$0xff]  ;;  %v289_v10 = vld [vmem:[%s1892_s30 + $0x38] sm:$0xff]  ;;  %v290_v11 = vld [vmem:[%s1892_s30 + $0x40] sm:$0xff] }
  0x13   : > { %v291_v12 = vld [vmem:[%s1892_s30 + $0x48] sm:$0xff]  ;;  %v292_v13 = vld [vmem:[%s1892_s30 + $0x50] sm:$0xff]  ;;  %v293_v14 = vld [vmem:[%s1892_s30 + $0x58] sm:$0xff] }
  0x14   : > { %v294_v15 = vld [vmem:[%s1892_s30 + $0x60] sm:$0xff]  ;;  %v295_v16 = vld [vmem:[%s1892_s30 + $0x68] sm:$0xff]  ;;  %v296_v17 = vld [vmem:[%s1892_s30 + $0x70] sm:$0xff] }
  0x15   : > { %1824 = vset.pattern.permute.xlu1 %v1835_v3  ;;  %1822 = vset.pattern.permute.xlu0 %v1835_v3  ;;  %v297_v18 = vld [vmem:[%s1892_s30 + $0x78] sm:$0xff]  ;;  %v298_v19 = vld [vmem:[%s1892_s30 + $0x80] sm:$0xff]  ;;  %v299_v20 = vld [vmem:[%s1892_s30 + $0x88] sm:$0xff] }
  0x16   : > { %516 = vperm.xlu1 %1824, %v283_v1   ;;  %512 = vperm.xlu0 %1822, %v282_v2   ;;  %v300_v21 = vld [vmem:[%s1892_s30 + $0x90] sm:$0xff]  ;;  %v301_v22 = vld [vmem:[%s1892_s30 + $0x98] sm:$0xff]  ;;  %v302_v23 = vld [vmem:[%s1892_s30 + $0xa0] sm:$0xff] }
  0x17   : > { %v303_v24 = vld [vmem:[%s1892_s30 + $0xa8] sm:$0xff]  ;;  %v304_v25 = vld [vmem:[%s1892_s30 + $0xb0] sm:$0xff]  ;;  %v305_v26 = vld [vmem:[%s1892_s30 + $0xb8] sm:$0xff] }
  0x18   : > { %v306_v27 = vld [vmem:[%s1892_s30 + $0xc0] sm:$0xff]  ;;  %v307_v28 = vld [vmem:[%s1892_s30 + $0xc8] sm:$0xff]  ;;  %v308_v29 = vld [vmem:[%s1892_s30 + $0xd0] sm:$0xff] }
  0x19   : > { %v309_v30 = vld [vmem:[%s1892_s30 + $0xd8] sm:$0xff]  ;;  %v310_v31 = vld [vmem:[%s1892_s30 + $0xe0] sm:$0xff]  ;;  %v311_v32 = vld [vmem:[%s1892_s30 + $0xe8] sm:$0xff] }
  0x1a   : > { %1825 = vset.pattern.permute.xlu1 %v1834_v0  ;;  %520 = vperm.xlu0 %1822, %v284_v4   ;;  %v312_v34 = vld [vmem:[%s1892_s30 + $0xf0] sm:$0xff]  ;;  %v313_v36 = vld [vmem:[%s1892_s30 + $0xf8] sm:$0xff] }
  0x1b   : > { %327 = vperm.xlu1 %1825, %v284_v4  }
  0x1e   : > { %524 = vperm.xlu0 %1822, %v285_v5  }
  0x1f   : > { %332 = vperm.xlu1 %1825, %v285_v5  }
  0x22   : > { %528 = vperm.xlu0 %1822, %v286_v7  }
  0x23   : > { %337 = vperm.xlu1 %1825, %v286_v7  }
  0x26   : > { %532 = vperm.xlu0 %1822, %v287_v8  }
  0x27   : > { %342 = vperm.xlu1 %1825, %v287_v8  }
  0x2a   : > { %536 = vperm.xlu0 %1822, %v288_v9  }
  0x2b   : > { %347 = vperm.xlu1 %1825, %v288_v9  }
  0x2e   : > { %540 = vperm.xlu0 %1822, %v289_v10  }
  0x2f   : > { %352 = vperm.xlu1 %1825, %v289_v10  }
  0x32   : > { %544 = vperm.xlu0 %1822, %v290_v11  }
  0x33   : > { %357 = vperm.xlu1 %1825, %v290_v11  }
  0x36   : > { %548 = vperm.xlu0 %1822, %v291_v12  }
  0x37   : > { %362 = vperm.xlu1 %1825, %v291_v12  }
  0x3a   : > { %552 = vperm.xlu0 %1822, %v292_v13  }
  0x3b   : > { %367 = vperm.xlu1 %1825, %v292_v13  }
  0x3e   : > { %556 = vperm.xlu0 %1822, %v293_v14  }
  0x3f   : > { %372 = vperm.xlu1 %1825, %v293_v14  }
  0x42   : > { %560 = vperm.xlu0 %1822, %v294_v15  }
  0x43   : > { %377 = vperm.xlu1 %1825, %v294_v15  }
  0x46   : > { %564 = vperm.xlu0 %1822, %v295_v16  }
  0x47   : > { %382 = vperm.xlu1 %1825, %v295_v16  }
  0x4a   : > { %568 = vperm.xlu0 %1822, %v296_v17  }
  0x4b   : > { %387 = vperm.xlu1 %1825, %v296_v17  }
  0x4e   : > { %572 = vperm.xlu0 %1822, %v297_v18  }
  0x4f   : > { %392 = vperm.xlu1 %1825, %v297_v18  }
  0x52   : > { %576 = vperm.xlu0 %1822, %v298_v19  }
  0x53   : > { %397 = vperm.xlu1 %1825, %v298_v19  }
  0x56   : > { %580 = vperm.xlu0 %1822, %v299_v20  }
  0x57   : > { %402 = vperm.xlu1 %1825, %v299_v20  }
  0x5a   : > { %584 = vperm.xlu0 %1822, %v300_v21  }
  0x5b   : > { %407 = vperm.xlu1 %1825, %v300_v21  }
  0x5e   : > { %588 = vperm.xlu0 %1822, %v301_v22  }
  0x5f   : > { %412 = vperm.xlu1 %1825, %v301_v22  }
  0x62   : > { %592 = vperm.xlu0 %1822, %v302_v23  }
  0x63   : > { %417 = vperm.xlu1 %1825, %v302_v23  }
  0x66   : > { %596 = vperm.xlu0 %1822, %v303_v24  }
  0x67   : > { %422 = vperm.xlu1 %1825, %v303_v24  }
  0x6a   : > { %600 = vperm.xlu0 %1822, %v304_v25  }
  0x6b   : > { %427 = vperm.xlu1 %1825, %v304_v25  }
  0x6e   : > { %604 = vperm.xlu0 %1822, %v305_v26  }
  0x6f   : > { %432 = vperm.xlu1 %1825, %v305_v26  }
  0x72   : > { %608 = vperm.xlu0 %1822, %v306_v27  }
  0x73   : > { %437 = vperm.xlu1 %1825, %v306_v27  }
  0x76   : > { %612 = vperm.xlu0 %1822, %v307_v28  }
  0x77   : > { %442 = vperm.xlu1 %1825, %v307_v28  }
  0x7a   : > { %616 = vperm.xlu0 %1822, %v308_v29  }
  0x7b   : > { %447 = vperm.xlu1 %1825, %v308_v29  }
  0x7e   : > { %620 = vperm.xlu0 %1822, %v309_v30  }
  0x7f   : > { %452 = vperm.xlu1 %1825, %v309_v30  }
  0x82   : > { %624 = vperm.xlu0 %1822, %v310_v31  }
  0x83   : > { %457 = vperm.xlu1 %1825, %v310_v31  }
  0x86   : > { %628 = vperm.xlu0 %1822, %v311_v32  }
  0x87   : > { %462 = vperm.xlu1 %1825, %v311_v32  }
  0x8a   : > { %632 = vperm.xlu0 %1822, %v312_v34  }
  0x8b   : > { %467 = vperm.xlu1 %1825, %v312_v34  }
  0x8e   : > { %636 = vperm.xlu0 %1822, %v313_v36  }
  0x8f   : > { %472 = vperm.xlu1 %1825, %v313_v36  }
  0x90   : > { %v323_v40 = vpop.permute.xlu1 %322  ;;  %v318_v41 = vpop.permute.xlu0 %317 }
  0x91   : > { %v480_v46 = vmul.f32 %v1932_v42, %v323_v40  ;;  %v479_v47 = vmul.f32 %v1932_v42, %v318_v41 }
  0x95   : > { %v517_v44 = vpop.permute.xlu1 %516  ;;  %v513_v45 = vpop.permute.xlu0 %512 }
  0x96   : > { %v644_v48 = vmul.f32 %v1934_v43, %v517_v44  ;;  %v643_v49 = vmul.f32 %v1934_v43, %v513_v45 }
  0x98   : > { %v676_v51 = vadd.f32 %v644_v48, %v480_v46  ;;  %v675_v52 = vadd.f32 %v643_v49, %v479_v47 }
  0x99   : > { %v521_v53 = vpop.permute.xlu0 %520 }
  0x9a   : > { %v715_v54 = vadd.f32 %v1943_v50, %v676_v51  ;;  %v645_v55 = vmul.f32 %v1934_v43, %v521_v53  ;;  %v328_v56 = vpop.permute.xlu1 %327  ;;  %v714_v57 = vadd.f32 %v1943_v50, %v675_v52 }
  0x9b   : > { %v481_v58 = vmul.f32 %v1932_v42, %v328_v56 }
  0x9c   : > { %v747_v59 = vmax.f32 %v715_v54, 0.0  ;;  %v746_v60 = vmax.f32 %v714_v57, 0.0 }
  0x9d   : > { %v677_v61 = vadd.f32 %v645_v55, %v481_v58  ;;  %v525_v62 = vpop.permute.xlu0 %524 }
  0x9e   : > { %v646_v63 = vmul.f32 %v1934_v43, %v525_v62  ;;  %v333_v0 = vpop.permute.xlu1 %332  ;;  %1707 = vmatprep.mubr.msk.f32.mxu0 %vm786_vm0, %v746_v60 }
  0x9f   : > { %v716_v1 = vadd.f32 %v1943_v50, %v677_v61  ;;  %v482_v2 = vmul.f32 %v1932_v42, %v333_v0  ;;  %1708 = vmatmul.mubr.msk.f32.vlgmr.msra.gmra.mrb[0].mxu0 %vm786_vm0, %v747_v59 }
  0xa1   : > { %v748_v3 = vmax.f32 %v716_v1, 0.0  ;;  %v678_v4 = vadd.f32 %v646_v63, %v482_v2  ;;  %v529_v5 = vpop.permute.xlu0 %528 }
  0xa2   : > { %v647_v6 = vmul.f32 %v1934_v43, %v529_v5  ;;  %v338_v7 = vpop.permute.xlu1 %337 }
  0xa3   : > { %v717_v8 = vadd.f32 %v1943_v50, %v678_v4  ;;  %v483_v9 = vmul.f32 %v1932_v42, %v338_v7  ;;  %1710 = vmatprep.mubr.msk.f32.mxu0 %vm786_vm0, %v748_v3 }
  0xa5   : > { %v749_v10 = vmax.f32 %v717_v8, 0.0  ;;  %v679_v11 = vadd.f32 %v647_v6, %v483_v9  ;;  %v533_v12 = vpop.permute.xlu0 %532 }
  0xa6   : > { %v648_v13 = vmul.f32 %v1934_v43, %v533_v12  ;;  %v343_v14 = vpop.permute.xlu1 %342 }
  0xa7   : > { %v718_v15 = vadd.f32 %v1943_v50, %v679_v11  ;;  %v484_v16 = vmul.f32 %v1932_v42, %v343_v14  ;;  %1711 = vmatmul.mubr.msk.f32.gmra.mrb[2].mxu0 %vm786_vm0, %v749_v10 }
  0xa9   : > { %v750_v17 = vmax.f32 %v718_v15, 0.0  ;;  %v680_v18 = vadd.f32 %v648_v13, %v484_v16  ;;  %v537_v19 = vpop.permute.xlu0 %536 }
  0xaa   : > { %v649_v20 = vmul.f32 %v1934_v43, %v537_v19  ;;  %v348_v21 = vpop.permute.xlu1 %347 }
  0xab   : > { %v719_v22 = vadd.f32 %v1943_v50, %v680_v18  ;;  %v485_v23 = vmul.f32 %v1932_v42, %v348_v21  ;;  %1713 = vmatprep.mubr.msk.f32.mxu0 %vm786_vm0, %v750_v17 }
  0xad   : > { %v751_v24 = vmax.f32 %v719_v22, 0.0  ;;  %v681_v25 = vadd.f32 %v649_v20, %v485_v23  ;;  %v541_v26 = vpop.permute.xlu0 %540 }
  0xae   : > { %v650_v27 = vmul.f32 %v1934_v43, %v541_v26  ;;  %v353_v28 = vpop.permute.xlu1 %352 }
  0xaf   : > { %v720_v29 = vadd.f32 %v1943_v50, %v681_v25  ;;  %v486_v30 = vmul.f32 %v1932_v42, %v353_v28  ;;  %1714 = vmatmul.mubr.msk.f32.gmra.mrb[4].mxu0 %vm786_vm0, %v751_v24 }
  0xb1   : > { %v752_v31 = vmax.f32 %v720_v29, 0.0  ;;  %v682_v32 = vadd.f32 %v650_v27, %v486_v30  ;;  %v545_v33 = vpop.permute.xlu0 %544 }
  0xb2   : > { %v651_v34 = vmul.f32 %v1934_v43, %v545_v33  ;;  %v358_v35 = vpop.permute.xlu1 %357 }
  0xb3   : > { %v721_v36 = vadd.f32 %v1943_v50, %v682_v32  ;;  %v487_v37 = vmul.f32 %v1932_v42, %v358_v35  ;;  %1716 = vmatprep.mubr.msk.f32.mxu0 %vm786_vm0, %v752_v31 }
  0xb5   : > { %v753_v38 = vmax.f32 %v721_v36, 0.0  ;;  %v683_v39 = vadd.f32 %v651_v34, %v487_v37  ;;  %v549_v40 = vpop.permute.xlu0 %548 }
  0xb6   : > { %v652_v41 = vmul.f32 %v1934_v43, %v549_v40  ;;  %v363_v44 = vpop.permute.xlu1 %362 }
  0xb7   : > { %v722_v45 = vadd.f32 %v1943_v50, %v683_v39  ;;  %v488_v46 = vmul.f32 %v1932_v42, %v363_v44  ;;  %1717 = vmatmul.mubr.msk.f32.gmra.mrb[6].mxu0 %vm786_vm0, %v753_v38 }
  0xb9   : > { %v754_v47 = vmax.f32 %v722_v45, 0.0  ;;  %v684_v48 = vadd.f32 %v652_v41, %v488_v46  ;;  %v553_v49 = vpop.permute.xlu0 %552 }
  0xba   : > { %v653_v51 = vmul.f32 %v1934_v43, %v553_v49  ;;  %v368_v52 = vpop.permute.xlu1 %367 }
  0xbb   : > { %v723_v53 = vadd.f32 %v1943_v50, %v684_v48  ;;  %v489_v54 = vmul.f32 %v1932_v42, %v368_v52  ;;  %1719 = vmatprep.mubr.msk.f32.mxu0 %vm786_vm0, %v754_v47 }
  0xbd   : > { %v755_v55 = vmax.f32 %v723_v53, 0.0  ;;  %v685_v56 = vadd.f32 %v653_v51, %v489_v54  ;;  %v557_v57 = vpop.permute.xlu0 %556 }
  0xbe   : > { %v654_v58 = vmul.f32 %v1934_v43, %v557_v57  ;;  %v373_v59 = vpop.permute.xlu1 %372 }
  0xbf   : > { %v724_v60 = vadd.f32 %v1943_v50, %v685_v56  ;;  %v490_v61 = vmul.f32 %v1932_v42, %v373_v59  ;;  %1720 = vmatmul.mubr.msk.f32.gmra.mrb[8].mxu0 %vm786_vm0, %v755_v55 }
  0xc1   : > { %v756_v62 = vmax.f32 %v724_v60, 0.0  ;;  %v686_v63 = vadd.f32 %v654_v58, %v490_v61  ;;  %v561_v0 = vpop.permute.xlu0 %560 }
  0xc2   : > { %v655_v1 = vmul.f32 %v1934_v43, %v561_v0  ;;  %v378_v2 = vpop.permute.xlu1 %377 }
  0xc3   : > { %v725_v3 = vadd.f32 %v1943_v50, %v686_v63  ;;  %v491_v4 = vmul.f32 %v1932_v42, %v378_v2  ;;  %1722 = vmatprep.mubr.msk.f32.mxu0 %vm786_vm0, %v756_v62 }
  0xc5   : > { %v757_v5 = vmax.f32 %v725_v3, 0.0  ;;  %v687_v6 = vadd.f32 %v655_v1, %v491_v4  ;;  %v565_v7 = vpop.permute.xlu0 %564 }
  0xc6   : > { %v656_v8 = vmul.f32 %v1934_v43, %v565_v7  ;;  %v383_v9 = vpop.permute.xlu1 %382 }
  0xc7   : > { %v726_v10 = vadd.f32 %v1943_v50, %v687_v6  ;;  %v492_v11 = vmul.f32 %v1932_v42, %v383_v9  ;;  %1723 = vmatmul.mubr.msk.f32.gmra.mrb[10].mxu0 %vm786_vm0, %v757_v5 }
  0xc9   : > { %v758_v12 = vmax.f32 %v726_v10, 0.0  ;;  %v688_v13 = vadd.f32 %v656_v8, %v492_v11  ;;  %v569_v14 = vpop.permute.xlu0 %568 }
  0xca   : > { %v657_v15 = vmul.f32 %v1934_v43, %v569_v14  ;;  %v388_v16 = vpop.permute.xlu1 %387 }
  0xcb   : > { %v727_v17 = vadd.f32 %v1943_v50, %v688_v13  ;;  %v493_v18 = vmul.f32 %v1932_v42, %v388_v16  ;;  %1725 = vmatprep.mubr.msk.f32.mxu0 %vm786_vm0, %v758_v12 }
  0xcd   : > { %v759_v19 = vmax.f32 %v727_v17, 0.0  ;;  %v689_v20 = vadd.f32 %v657_v15, %v493_v18  ;;  %v573_v21 = vpop.permute.xlu0 %572 }
  0xce   : > { %v658_v22 = vmul.f32 %v1934_v43, %v573_v21  ;;  %v393_v23 = vpop.permute.xlu1 %392 }
  0xcf   : > { %v728_v24 = vadd.f32 %v1943_v50, %v689_v20  ;;  %v494_v25 = vmul.f32 %v1932_v42, %v393_v23  ;;  %1726 = vmatmul.mubr.msk.f32.gmra.mrb[12].mxu0 %vm786_vm0, %v759_v19 }
  0xd1   : > { %v760_v26 = vmax.f32 %v728_v24, 0.0  ;;  %v690_v27 = vadd.f32 %v658_v22, %v494_v25  ;;  %v577_v28 = vpop.permute.xlu0 %576 }
  0xd2   : > { %v659_v29 = vmul.f32 %v1934_v43, %v577_v28  ;;  %v398_v30 = vpop.permute.xlu1 %397 }
  0xd3   : > { %v729_v31 = vadd.f32 %v1943_v50, %v690_v27  ;;  %v495_v32 = vmul.f32 %v1932_v42, %v398_v30  ;;  %1728 = vmatprep.mubr.msk.f32.mxu0 %vm786_vm0, %v760_v26  ;;  %v1140_v26 = vld [vmem:[%s2260_s5] sm:$0xff]  ;;  %v1141_v27 = vld [vmem:[%s2260_s5 + $0x8] sm:$0xff] }
  0xd4   : > { %v1807_v30 = vpack.c.bf16 %v1141_v27, %v1140_v26 }
  0xd5   : > { %v761_v33 = vmax.f32 %v729_v31, 0.0  ;;  %v691_v34 = vadd.f32 %v659_v29, %v495_v32  ;;  %v581_v35 = vpop.permute.xlu0 %580 }
  0xd6   : > { %v660_v36 = vmul.f32 %v1934_v43, %v581_v35  ;;  %v403_v37 = vpop.permute.xlu1 %402  ;;  %1808 = vmatprep.subr.bf16.mxu1 %v1807_v30 }
  0xd7   : > { %v730_v38 = vadd.f32 %v1943_v50, %v691_v34  ;;  %v496_v39 = vmul.f32 %v1932_v42, %v403_v37  ;;  %1729 = vmatmul.mubr.msk.f32.gmra.mrb[14].mxu0 %vm786_vm0, %v761_v33  ;;  %1810 = vmatpush3.bf16.msra.mxu1 %v1807_v30 }
  0xd9   : > { %v762_v40 = vmax.f32 %v730_v38, 0.0  ;;  %v692_v41 = vadd.f32 %v660_v36, %v496_v39  ;;  %v585_v44 = vpop.permute.xlu0 %584 }
  0xda   : > { %v661_v45 = vmul.f32 %v1934_v43, %v585_v44  ;;  %v408_v46 = vpop.permute.xlu1 %407 }
  0xdb   : > { %v731_v47 = vadd.f32 %v1943_v50, %v692_v41  ;;  %v497_v48 = vmul.f32 %v1932_v42, %v408_v46  ;;  %1731 = vmatprep.mubr.msk.f32.mxu0 %vm786_vm0, %v762_v40 }
  0xdd   : > { %v763_v49 = vmax.f32 %v731_v47, 0.0  ;;  %v693_v51 = vadd.f32 %v661_v45, %v497_v48  ;;  %v589_v52 = vpop.permute.xlu0 %588 }
  0xde   : > { %v662_v53 = vmul.f32 %v1934_v43, %v589_v52  ;;  %v413_v54 = vpop.permute.xlu1 %412 }
  0xdf   : > { %v732_v55 = vadd.f32 %v1943_v50, %v693_v51  ;;  %v498_v56 = vmul.f32 %v1932_v42, %v413_v54  ;;  %1732 = vmatmul.mubr.msk.f32.gmra.mrb[16].mxu0 %vm786_vm0, %v763_v49 }
  0xe1   : > { %v764_v57 = vmax.f32 %v732_v55, 0.0  ;;  %v694_v58 = vadd.f32 %v662_v53, %v498_v56  ;;  %v593_v59 = vpop.permute.xlu0 %592 }
  0xe2   : > { %v663_v60 = vmul.f32 %v1934_v43, %v593_v59  ;;  %v418_v61 = vpop.permute.xlu1 %417 }
  0xe3   : > { %v733_v62 = vadd.f32 %v1943_v50, %v694_v58  ;;  %v499_v63 = vmul.f32 %v1932_v42, %v418_v61  ;;  %1734 = vmatprep.mubr.msk.f32.mxu0 %vm786_vm0, %v764_v57 }
  0xe5   : > { %v765_v0 = vmax.f32 %v733_v62, 0.0  ;;  %v695_v1 = vadd.f32 %v663_v60, %v499_v63  ;;  %v597_v2 = vpop.permute.xlu0 %596 }
  0xe6   : > { %v664_v3 = vmul.f32 %v1934_v43, %v597_v2  ;;  %v423_v4 = vpop.permute.xlu1 %422 }
  0xe7   : > { %v734_v5 = vadd.f32 %v1943_v50, %v695_v1  ;;  %v500_v6 = vmul.f32 %v1932_v42, %v423_v4  ;;  %1735 = vmatmul.mubr.msk.f32.gmra.mrb[18].mxu0 %vm786_vm0, %v765_v0 }
  0xe9   : > { %v766_v7 = vmax.f32 %v734_v5, 0.0  ;;  %v696_v8 = vadd.f32 %v664_v3, %v500_v6  ;;  %v601_v9 = vpop.permute.xlu0 %600 }
  0xea   : > { %v665_v10 = vmul.f32 %v1934_v43, %v601_v9  ;;  %v428_v11 = vpop.permute.xlu1 %427 }
  0xeb   : > { %v735_v12 = vadd.f32 %v1943_v50, %v696_v8  ;;  %v501_v13 = vmul.f32 %v1932_v42, %v428_v11  ;;  %1737 = vmatprep.mubr.msk.f32.mxu0 %vm786_vm0, %v766_v7 }
  0xed   : > { %v767_v14 = vmax.f32 %v735_v12, 0.0  ;;  %v697_v15 = vadd.f32 %v665_v10, %v501_v13  ;;  %v605_v16 = vpop.permute.xlu0 %604 }
  0xee   : > { %v666_v17 = vmul.f32 %v1934_v43, %v605_v16  ;;  %v433_v18 = vpop.permute.xlu1 %432 }
  0xef   : > { %v736_v19 = vadd.f32 %v1943_v50, %v697_v15  ;;  %v502_v20 = vmul.f32 %v1932_v42, %v433_v18  ;;  %1738 = vmatmul.mubr.msk.f32.gmra.mrb[20].mxu0 %vm786_vm0, %v767_v14 }
  0xf1   : > { %v768_v21 = vmax.f32 %v736_v19, 0.0  ;;  %v698_v22 = vadd.f32 %v666_v17, %v502_v20  ;;  %v609_v23 = vpop.permute.xlu0 %608 }
  0xf2   : > { %v667_v24 = vmul.f32 %v1934_v43, %v609_v23  ;;  %v438_v25 = vpop.permute.xlu1 %437 }
  0xf3   : > { %v737_v28 = vadd.f32 %v1943_v50, %v698_v22  ;;  %v503_v29 = vmul.f32 %v1932_v42, %v438_v25  ;;  %1740 = vmatprep.mubr.msk.f32.mxu0 %vm786_vm0, %v768_v21 }
  0xf5   : > { %v769_v31 = vmax.f32 %v737_v28, 0.0  ;;  %v699_v32 = vadd.f32 %v667_v24, %v503_v29  ;;  %v613_v33 = vpop.permute.xlu0 %612 }
  0xf6   : > { %v668_v34 = vmul.f32 %v1934_v43, %v613_v33  ;;  %v443_v35 = vpop.permute.xlu1 %442 }
  0xf7   : > { %v738_v36 = vadd.f32 %v1943_v50, %v699_v32  ;;  %v504_v37 = vmul.f32 %v1932_v42, %v443_v35  ;;  %1741 = vmatmul.mubr.msk.f32.gmra.mrb[22].mxu0 %vm786_vm0, %v769_v31 }
  0xf9   : > { %v770_v38 = vmax.f32 %v738_v36, 0.0  ;;  %v700_v39 = vadd.f32 %v668_v34, %v504_v37  ;;  %v617_v40 = vpop.permute.xlu0 %616 }
  0xfa   : > { %v669_v41 = vmul.f32 %v1934_v43, %v617_v40  ;;  %v448_v44 = vpop.permute.xlu1 %447 }
  0xfb   : > { %v739_v45 = vadd.f32 %v1943_v50, %v700_v39  ;;  %v505_v46 = vmul.f32 %v1932_v42, %v448_v44  ;;  %1743 = vmatprep.mubr.msk.f32.mxu0 %vm786_vm0, %v770_v38 }
  0xfd   : > { %v771_v47 = vmax.f32 %v739_v45, 0.0  ;;  %v701_v48 = vadd.f32 %v669_v41, %v505_v46  ;;  %v621_v49 = vpop.permute.xlu0 %620 }
  0xfe   : > { %v670_v51 = vmul.f32 %v1934_v43, %v621_v49  ;;  %v453_v52 = vpop.permute.xlu1 %452 }
  0xff   : > { %v740_v53 = vadd.f32 %v1943_v50, %v701_v48  ;;  %v506_v54 = vmul.f32 %v1932_v42, %v453_v52  ;;  %1744 = vmatmul.mubr.msk.f32.gmra.mrb[24].mxu0 %vm786_vm0, %v771_v47 }
 0x101   : > { %v772_v55 = vmax.f32 %v740_v53, 0.0  ;;  %v702_v56 = vadd.f32 %v670_v51, %v506_v54  ;;  %v625_v57 = vpop.permute.xlu0 %624 }
 0x102   : > { %v671_v58 = vmul.f32 %v1934_v43, %v625_v57  ;;  %v458_v59 = vpop.permute.xlu1 %457 }
 0x103   : > { %v741_v60 = vadd.f32 %v1943_v50, %v702_v56  ;;  %v507_v61 = vmul.f32 %v1932_v42, %v458_v59  ;;  %1746 = vmatprep.mubr.msk.f32.mxu0 %vm786_vm0, %v772_v55 }
 0x105   : > { %v773_v62 = vmax.f32 %v741_v60, 0.0  ;;  %v703_v63 = vadd.f32 %v671_v58, %v507_v61  ;;  %v629_v0 = vpop.permute.xlu0 %628 }
 0x106   : > { %v672_v1 = vmul.f32 %v1934_v43, %v629_v0  ;;  %v463_v2 = vpop.permute.xlu1 %462 }
 0x107   : > { %v742_v3 = vadd.f32 %v1943_v50, %v703_v63  ;;  %v508_v4 = vmul.f32 %v1932_v42, %v463_v2  ;;  %1747 = vmatmul.mubr.msk.f32.gmra.mrb[26].mxu0 %vm786_vm0, %v773_v62 }
 0x109   : > { %v774_v5 = vmax.f32 %v742_v3, 0.0  ;;  %v704_v6 = vadd.f32 %v672_v1, %v508_v4  ;;  %v633_v7 = vpop.permute.xlu0 %632 }
 0x10a   : > { %v673_v8 = vmul.f32 %v1934_v43, %v633_v7  ;;  %v468_v9 = vpop.permute.xlu1 %467 }
 0x10b   : > { %v743_v10 = vadd.f32 %v1943_v50, %v704_v6  ;;  %v509_v11 = vmul.f32 %v1932_v42, %v468_v9  ;;  %1749 = vmatprep.mubr.msk.f32.mxu0 %vm786_vm0, %v774_v5 }
 0x10d   : > { %v775_v12 = vmax.f32 %v743_v10, 0.0  ;;  %v705_v13 = vadd.f32 %v673_v8, %v509_v11  ;;  %v637_v14 = vpop.permute.xlu0 %636 }
 0x10e   : > { %v674_v15 = vmul.f32 %v1934_v43, %v637_v14  ;;  %v473_v16 = vpop.permute.xlu1 %472  ;;  %v2078_v43 = vld [vmem:[%s2259_s4] ss:$0 sm:$0xff] }
 0x10f   : > { %v744_v17 = vadd.f32 %v1943_v50, %v705_v13  ;;  %v510_v18 = vmul.f32 %v1932_v42, %v473_v16  ;;  %1750 = vmatmul.mubr.msk.f32.gmra.mrb[28].mxu0 %vm786_vm0, %v775_v12 }
 0x111   : > { %v776_v19 = vmax.f32 %v744_v17, 0.0  ;;  %v706_v20 = vadd.f32 %v674_v15, %v510_v18 }
 0x113   : > { %v745_v21 = vadd.f32 %v1943_v50, %v706_v20  ;;  %1752 = vmatprep.mubr.msk.f32.mxu0 %vm786_vm0, %v776_v19 }
 0x115   : > { %v777_v22 = vmax.f32 %v745_v21, 0.0 }
 0x117   : > { %1753 = vmatmul.mubr.msk.f32.gmra.mrb[30].mxu0 %vm786_vm0, %v777_v22 }
 0x172   : > { %v1709_v23 = vpop.f32.mrb[0].mxu0 }
 0x173   : > { %v955_v24 = vadd.f32 %v1709_v23, %v2078_v43  ;;  %v949_v42 = vpop.f32.mrb[1].mxu0 }
 0x174   : > { %v950_v25 = vadd.f32 %v2078_v43, %v949_v42 }
 0x175   : > { %v1109_v27 = vmax.f32 %v955_v24, 0.0 }
 0x176   : > { %v1108_v26 = vmax.f32 %v950_v25, 0.0 }
 0x178   : > { %1759 = vmatprep.mubr.msk.f32.mxu1 %vm1149_vm1, %v1108_v26 }
 0x179   : > { %1760 = vmatmul.mubr.msk.f32.vlgmr.msra.gmra.mrb[0].mxu1 %vm1149_vm1, %v1109_v27 }
 0x17a   : > { %v1712_v50 = vpop.f32.mrb[2].mxu0 }
 0x17b   : > { %v965_v28 = vadd.f32 %v1712_v50, %v2078_v43  ;;  %v959_v29 = vpop.f32.mrb[3].mxu0 }
 0x17c   : > { %v960_v30 = vadd.f32 %v2078_v43, %v959_v29 }
 0x17d   : > { %v1111_v32 = vmax.f32 %v965_v28, 0.0 }
 0x17e   : > { %v1110_v31 = vmax.f32 %v960_v30, 0.0 }
 0x180   : > { %1762 = vmatprep.mubr.msk.f32.mxu1 %vm1149_vm1, %v1110_v31 }
 0x181   : > { %1763 = vmatmul.mubr.msk.f32.gmra.mrb[2].mxu1 %vm1149_vm1, %v1111_v32 }
 0x182   : > { %v1715_v33 = vpop.f32.mrb[4].mxu0 }
 0x183   : > { %v975_v34 = vadd.f32 %v1715_v33, %v2078_v43  ;;  %v969_v35 = vpop.f32.mrb[5].mxu0 }
 0x184   : > { %v970_v36 = vadd.f32 %v2078_v43, %v969_v35 }
 0x185   : > { %v1113_v38 = vmax.f32 %v975_v34, 0.0 }
 0x186   : > { %v1112_v37 = vmax.f32 %v970_v36, 0.0 }
 0x188   : > { %1765 = vmatprep.mubr.msk.f32.mxu1 %vm1149_vm1, %v1112_v37 }
 0x189   : > { %1766 = vmatmul.mubr.msk.f32.gmra.mrb[4].mxu1 %vm1149_vm1, %v1113_v38 }
 0x18a   : > { %v1718_v39 = vpop.f32.mrb[6].mxu0 }
 0x18b   : > { %v985_v40 = vadd.f32 %v1718_v39, %v2078_v43  ;;  %v979_v41 = vpop.f32.mrb[7].mxu0 }
 0x18c   : > { %v980_v44 = vadd.f32 %v2078_v43, %v979_v41 }
 0x18d   : > { %v1115_v46 = vmax.f32 %v985_v40, 0.0 }
 0x18e   : > { %v1114_v45 = vmax.f32 %v980_v44, 0.0 }
 0x190   : > { %1768 = vmatprep.mubr.msk.f32.mxu1 %vm1149_vm1, %v1114_v45 }
 0x191   : > { %1769 = vmatmul.mubr.msk.f32.gmra.mrb[6].mxu1 %vm1149_vm1, %v1115_v46 }
 0x192   : > { %v1721_v47 = vpop.f32.mrb[8].mxu0 }
 0x193   : > { %v995_v48 = vadd.f32 %v1721_v47, %v2078_v43  ;;  %v989_v49 = vpop.f32.mrb[9].mxu0 }
 0x194   : > { %v990_v51 = vadd.f32 %v2078_v43, %v989_v49 }
 0x195   : > { %v1117_v53 = vmax.f32 %v995_v48, 0.0 }
 0x196   : > { %v1116_v52 = vmax.f32 %v990_v51, 0.0 }
 0x198   : > { %1771 = vmatprep.mubr.msk.f32.mxu1 %vm1149_vm1, %v1116_v52 }
 0x199   : > { %1772 = vmatmul.mubr.msk.f32.gmra.mrb[8].mxu1 %vm1149_vm1, %v1117_v53 }
 0x19a   : > { %v1724_v54 = vpop.f32.mrb[10].mxu0 }
 0x19b   : > { %v1005_v55 = vadd.f32 %v1724_v54, %v2078_v43  ;;  %v999_v56 = vpop.f32.mrb[11].mxu0 }
 0x19c   : > { %v1000_v57 = vadd.f32 %v2078_v43, %v999_v56 }
 0x19d   : > { %v1119_v59 = vmax.f32 %v1005_v55, 0.0 }
 0x19e   : > { %v1118_v58 = vmax.f32 %v1000_v57, 0.0  ;;  %v2147_v57 = vld [vmem:[%s2261_s6] ss:$0 sm:$0xff] }
 0x1a0   : > { %1774 = vmatprep.mubr.msk.f32.mxu1 %vm1149_vm1, %v1118_v58 }
 0x1a1   : > { %1775 = vmatmul.mubr.msk.f32.gmra.mrb[10].mxu1 %vm1149_vm1, %v1119_v59 }
 0x1a2   : > { %v1727_v60 = vpop.f32.mrb[12].mxu0 }
 0x1a3   : > { %v1015_v61 = vadd.f32 %v1727_v60, %v2078_v43  ;;  %v1009_v62 = vpop.f32.mrb[13].mxu0 }
 0x1a4   : > { %v1010_v63 = vadd.f32 %v2078_v43, %v1009_v62 }
 0x1a5   : > { %v1121_v1 = vmax.f32 %v1015_v61, 0.0 }
 0x1a6   : > { %v1120_v0 = vmax.f32 %v1010_v63, 0.0 }
 0x1a8   : > { %1777 = vmatprep.mubr.msk.f32.mxu1 %vm1149_vm1, %v1120_v0 }
 0x1a9   : > { %1778 = vmatmul.mubr.msk.f32.gmra.mrb[12].mxu1 %vm1149_vm1, %v1121_v1 }
 0x1aa   : > { %v1730_v2 = vpop.f32.mrb[14].mxu0 }
 0x1ab   : > { %v1025_v3 = vadd.f32 %v1730_v2, %v2078_v43  ;;  %v1019_v4 = vpop.f32.mrb[15].mxu0 }
 0x1ac   : > { %v1020_v5 = vadd.f32 %v2078_v43, %v1019_v4 }
 0x1ad   : > { %v1123_v7 = vmax.f32 %v1025_v3, 0.0 }
 0x1ae   : > { %v1122_v6 = vmax.f32 %v1020_v5, 0.0 }
 0x1b0   : > { %1780 = vmatprep.mubr.msk.f32.mxu1 %vm1149_vm1, %v1122_v6 }
 0x1b1   : > { %1781 = vmatmul.mubr.msk.f32.gmra.mrb[14].mxu1 %vm1149_vm1, %v1123_v7 }
 0x1b2   : > { %v1733_v8 = vpop.f32.mrb[16].mxu0 }
 0x1b3   : > { %v1035_v9 = vadd.f32 %v1733_v8, %v2078_v43  ;;  %v1029_v10 = vpop.f32.mrb[17].mxu0 }
 0x1b4   : > { %v1030_v11 = vadd.f32 %v2078_v43, %v1029_v10 }
 0x1b5   : > { %v1125_v13 = vmax.f32 %v1035_v9, 0.0 }
 0x1b6   : > { %v1124_v12 = vmax.f32 %v1030_v11, 0.0 }
 0x1b8   : > { %1783 = vmatprep.mubr.msk.f32.mxu1 %vm1149_vm1, %v1124_v12 }
 0x1b9   : > { %1784 = vmatmul.mubr.msk.f32.gmra.mrb[16].mxu1 %vm1149_vm1, %v1125_v13 }
 0x1ba   : > { %v1736_v14 = vpop.f32.mrb[18].mxu0 }
 0x1bb   : > { %v1045_v15 = vadd.f32 %v1736_v14, %v2078_v43  ;;  %v1039_v16 = vpop.f32.mrb[19].mxu0 }
 0x1bc   : > { %v1040_v17 = vadd.f32 %v2078_v43, %v1039_v16 }
 0x1bd   : > { %v1127_v19 = vmax.f32 %v1045_v15, 0.0 }
 0x1be   : > { %v1126_v18 = vmax.f32 %v1040_v17, 0.0 }
 0x1c0   : > { %1786 = vmatprep.mubr.msk.f32.mxu1 %vm1149_vm1, %v1126_v18 }
 0x1c1   : > { %1787 = vmatmul.mubr.msk.f32.gmra.mrb[18].mxu1 %vm1149_vm1, %v1127_v19 }
 0x1c2   : > { %v1739_v20 = vpop.f32.mrb[20].mxu0 }
 0x1c3   : > { %v1055_v21 = vadd.f32 %v1739_v20, %v2078_v43  ;;  %v1049_v22 = vpop.f32.mrb[21].mxu0 }
 0x1c4   : > { %v1050_v23 = vadd.f32 %v2078_v43, %v1049_v22 }
 0x1c5   : > { %v1129_v42 = vmax.f32 %v1055_v21, 0.0 }
 0x1c6   : > { %v1128_v24 = vmax.f32 %v1050_v23, 0.0 }
 0x1c8   : > { %1789 = vmatprep.mubr.msk.f32.mxu1 %vm1149_vm1, %v1128_v24 }
 0x1c9   : > { %1790 = vmatmul.mubr.msk.f32.gmra.mrb[20].mxu1 %vm1149_vm1, %v1129_v42 }
 0x1ca   : > { %v1742_v25 = vpop.f32.mrb[22].mxu0 }
 0x1cb   : > { %v1065_v26 = vadd.f32 %v1742_v25, %v2078_v43  ;;  %v1059_v27 = vpop.f32.mrb[23].mxu0 }
 0x1cc   : > { %v1060_v50 = vadd.f32 %v2078_v43, %v1059_v27 }
 0x1cd   : > { %v1131_v29 = vmax.f32 %v1065_v26, 0.0 }
 0x1ce   : > { %v1130_v28 = vmax.f32 %v1060_v50, 0.0 }
 0x1d0   : > { %1792 = vmatprep.mubr.msk.f32.mxu1 %vm1149_vm1, %v1130_v28 }
 0x1d1   : > { %1793 = vmatmul.mubr.msk.f32.gmra.mrb[22].mxu1 %vm1149_vm1, %v1131_v29 }
 0x1d2   : > { %v1745_v30 = vpop.f32.mrb[24].mxu0 }
 0x1d3   : > { %v1075_v31 = vadd.f32 %v1745_v30, %v2078_v43  ;;  %v1069_v32 = vpop.f32.mrb[25].mxu0 }
 0x1d4   : > { %v1070_v33 = vadd.f32 %v2078_v43, %v1069_v32 }
 0x1d5   : > { %v1133_v35 = vmax.f32 %v1075_v31, 0.0 }
 0x1d6   : > { %v1132_v34 = vmax.f32 %v1070_v33, 0.0 }
 0x1d8   : > { %1795 = vmatprep.mubr.msk.f32.mxu1 %vm1149_vm1, %v1132_v34 }
 0x1d9   : > { %1796 = vmatmul.mubr.msk.f32.gmra.mrb[24].mxu1 %vm1149_vm1, %v1133_v35 }
 0x1da   : > { %v1748_v36 = vpop.f32.mrb[26].mxu0 }
 0x1db   : > { %v1085_v37 = vadd.f32 %v1748_v36, %v2078_v43  ;;  %v1079_v38 = vpop.f32.mrb[27].mxu0 }
 0x1dc   : > { %v1080_v39 = vadd.f32 %v2078_v43, %v1079_v38 }
 0x1dd   : > { %v1135_v41 = vmax.f32 %v1085_v37, 0.0 }
 0x1de   : > { %v1134_v40 = vmax.f32 %v1080_v39, 0.0 }
 0x1e0   : > { %1798 = vmatprep.mubr.msk.f32.mxu1 %vm1149_vm1, %v1134_v40 }
 0x1e1   : > { %1799 = vmatmul.mubr.msk.f32.gmra.mrb[26].mxu1 %vm1149_vm1, %v1135_v41 }
 0x1e2   : > { %v1751_v44 = vpop.f32.mrb[28].mxu0 }
 0x1e3   : > { %v1095_v45 = vadd.f32 %v1751_v44, %v2078_v43  ;;  %v1089_v46 = vpop.f32.mrb[29].mxu0 }
 0x1e4   : > { %v1090_v47 = vadd.f32 %v2078_v43, %v1089_v46 }
 0x1e5   : > { %v1137_v49 = vmax.f32 %v1095_v45, 0.0 }
 0x1e6   : > { %v1136_v48 = vmax.f32 %v1090_v47, 0.0 }
 0x1e8   : > { %1801 = vmatprep.mubr.msk.f32.mxu1 %vm1149_vm1, %v1136_v48 }
 0x1e9   : > { %1802 = vmatmul.mubr.msk.f32.gmra.mrb[28].mxu1 %vm1149_vm1, %v1137_v49 }
 0x1ea   : > { %v1754_v51 = vpop.f32.mrb[30].mxu0 }
 0x1eb   : > { %v1105_v52 = vadd.f32 %v1754_v51, %v2078_v43  ;;  %v1099_v53 = vpop.f32.mrb[31].mxu0 }
 0x1ec   : > { %v1100_v54 = vadd.f32 %v2078_v43, %v1099_v53 }
 0x1ed   : > { %v1139_v56 = vmax.f32 %v1105_v52, 0.0 }
 0x1ee   : > { %v1138_v55 = vmax.f32 %v1100_v54, 0.0 }
 0x1f0   : > { %1804 = vmatprep.mubr.msk.f32.mxu1 %vm1149_vm1, %v1138_v55 }
 0x1f1   : > { %1805 = vmatmul.mubr.msk.f32.gmra.mrb[30].mxu1 %vm1149_vm1, %v1139_v56 }
 0x24c   : > { %v1761_v43 = vpop.f32.mrb[0].mxu1 }
 0x24d   : > { %v1318_v58 = vadd.f32 %v1761_v43, %v2147_v57  ;;  %v1312_v59 = vpop.f32.mrb[1].mxu1 }
 0x24e   : > { %v1313_v60 = vadd.f32 %v2147_v57, %v1312_v59 }
 0x24f   : > { %1473 = vst.msk [vmem:[%s2154_s25 + $0x8] sm:$0xff] %vm1471_vm2, %v1318_v58 }
 0x250   : > { %1472 = vst.msk [vmem:[%s2154_s25] sm:$0xff] %vm1471_vm2, %v1313_v60 }
 0x254   : > { %v1764_v61 = vpop.f32.mrb[2].mxu1 }
 0x255   : > { %v1328_v62 = vadd.f32 %v1764_v61, %v2147_v57  ;;  %v1322_v63 = vpop.f32.mrb[3].mxu1 }
 0x256   : > { %v1323_v0 = vadd.f32 %v2147_v57, %v1322_v63 }
 0x257   : > { %1475 = vst.msk [vmem:[%s2154_s25 + $0x18] sm:$0xff] %vm1471_vm2, %v1328_v62 }
 0x258   : > { %1474 = vst.msk [vmem:[%s2154_s25 + $0x10] sm:$0xff] %vm1471_vm2, %v1323_v0 }
 0x25c   : > { %v1767_v1 = vpop.f32.mrb[4].mxu1 }
 0x25d   : > { %v1338_v2 = vadd.f32 %v1767_v1, %v2147_v57  ;;  %v1332_v3 = vpop.f32.mrb[5].mxu1 }
 0x25e   : > { %v1333_v4 = vadd.f32 %v2147_v57, %v1332_v3 }
 0x25f   : > { %1477 = vst.msk [vmem:[%s2154_s25 + $0x28] sm:$0xff] %vm1471_vm2, %v1338_v2 }
 0x260   : > { %1476 = vst.msk [vmem:[%s2154_s25 + $0x20] sm:$0xff] %vm1471_vm2, %v1333_v4 }
 0x264   : > { %v1770_v5 = vpop.f32.mrb[6].mxu1 }
 0x265   : > { %v1348_v6 = vadd.f32 %v1770_v5, %v2147_v57  ;;  %v1342_v7 = vpop.f32.mrb[7].mxu1 }
 0x266   : > { %v1343_v8 = vadd.f32 %v2147_v57, %v1342_v7 }
 0x267   : > { %1479 = vst.msk [vmem:[%s2154_s25 + $0x38] sm:$0xff] %vm1471_vm2, %v1348_v6 }
 0x268   : > { %1478 = vst.msk [vmem:[%s2154_s25 + $0x30] sm:$0xff] %vm1471_vm2, %v1343_v8 }
 0x26c   : > { %v1773_v9 = vpop.f32.mrb[8].mxu1 }
 0x26d   : > { %v1358_v10 = vadd.f32 %v1773_v9, %v2147_v57  ;;  %v1352_v11 = vpop.f32.mrb[9].mxu1 }
 0x26e   : > { %v1353_v12 = vadd.f32 %v2147_v57, %v1352_v11 }
 0x26f   : > { %1481 = vst.msk [vmem:[%s2154_s25 + $0x48] sm:$0xff] %vm1471_vm2, %v1358_v10 }
 0x270   : > { %1480 = vst.msk [vmem:[%s2154_s25 + $0x40] sm:$0xff] %vm1471_vm2, %v1353_v12 }
 0x274   : > { %v1776_v13 = vpop.f32.mrb[10].mxu1 }
 0x275   : > { %v1368_v14 = vadd.f32 %v1776_v13, %v2147_v57  ;;  %v1362_v15 = vpop.f32.mrb[11].mxu1 }
 0x276   : > { %v1363_v16 = vadd.f32 %v2147_v57, %v1362_v15 }
 0x277   : > { %1483 = vst.msk [vmem:[%s2154_s25 + $0x58] sm:$0xff] %vm1471_vm2, %v1368_v14 }
 0x278   : > { %1482 = vst.msk [vmem:[%s2154_s25 + $0x50] sm:$0xff] %vm1471_vm2, %v1363_v16 }
 0x27c   : > { %v1779_v17 = vpop.f32.mrb[12].mxu1 }
 0x27d   : > { %v1378_v18 = vadd.f32 %v1779_v17, %v2147_v57  ;;  %v1372_v19 = vpop.f32.mrb[13].mxu1 }
 0x27e   : > { %v1373_v20 = vadd.f32 %v2147_v57, %v1372_v19 }
 0x27f   : > { %1485 = vst.msk [vmem:[%s2154_s25 + $0x68] sm:$0xff] %vm1471_vm2, %v1378_v18 }
 0x280   : > { %1484 = vst.msk [vmem:[%s2154_s25 + $0x60] sm:$0xff] %vm1471_vm2, %v1373_v20 }
 0x284   : > { %v1782_v21 = vpop.f32.mrb[14].mxu1 }
 0x285   : > { %v1388_v22 = vadd.f32 %v1782_v21, %v2147_v57  ;;  %v1382_v23 = vpop.f32.mrb[15].mxu1 }
 0x286   : > { %v1383_v24 = vadd.f32 %v2147_v57, %v1382_v23 }
 0x287   : > { %1487 = vst.msk [vmem:[%s2154_s25 + $0x78] sm:$0xff] %vm1471_vm2, %v1388_v22 }
 0x288   : > { %1486 = vst.msk [vmem:[%s2154_s25 + $0x70] sm:$0xff] %vm1471_vm2, %v1383_v24 }
 0x28c   : > { %v1785_v42 = vpop.f32.mrb[16].mxu1 }
 0x28d   : > { %v1398_v25 = vadd.f32 %v1785_v42, %v2147_v57  ;;  %v1392_v26 = vpop.f32.mrb[17].mxu1 }
 0x28e   : > { %v1393_v27 = vadd.f32 %v2147_v57, %v1392_v26 }
 0x28f   : > { %1489 = vst.msk [vmem:[%s2154_s25 + $0x88] sm:$0xff] %vm1471_vm2, %v1398_v25 }
 0x290   : > { %1488 = vst.msk [vmem:[%s2154_s25 + $0x80] sm:$0xff] %vm1471_vm2, %v1393_v27 }
 0x294   : > { %v1788_v50 = vpop.f32.mrb[18].mxu1 }
 0x295   : > { %v1408_v28 = vadd.f32 %v1788_v50, %v2147_v57  ;;  %v1402_v29 = vpop.f32.mrb[19].mxu1 }
 0x296   : > { %v1403_v30 = vadd.f32 %v2147_v57, %v1402_v29 }
 0x297   : > { %1491 = vst.msk [vmem:[%s2154_s25 + $0x98] sm:$0xff] %vm1471_vm2, %v1408_v28 }
 0x298   : > { %1490 = vst.msk [vmem:[%s2154_s25 + $0x90] sm:$0xff] %vm1471_vm2, %v1403_v30 }
 0x29c   : > { %v1791_v31 = vpop.f32.mrb[20].mxu1 }
 0x29d   : > { %v1418_v32 = vadd.f32 %v1791_v31, %v2147_v57  ;;  %v1412_v33 = vpop.f32.mrb[21].mxu1 }
 0x29e   : > { %v1413_v34 = vadd.f32 %v2147_v57, %v1412_v33 }
 0x29f   : > { %1493 = vst.msk [vmem:[%s2154_s25 + $0xa8] sm:$0xff] %vm1471_vm2, %v1418_v32 }
 0x2a0   : > { %1492 = vst.msk [vmem:[%s2154_s25 + $0xa0] sm:$0xff] %vm1471_vm2, %v1413_v34 }
 0x2a4   : > { %v1794_v35 = vpop.f32.mrb[22].mxu1 }
 0x2a5   : > { %v1428_v36 = vadd.f32 %v1794_v35, %v2147_v57  ;;  %v1422_v37 = vpop.f32.mrb[23].mxu1 }
 0x2a6   : > { %v1423_v38 = vadd.f32 %v2147_v57, %v1422_v37 }
 0x2a7   : > { %1495 = vst.msk [vmem:[%s2154_s25 + $0xb8] sm:$0xff] %vm1471_vm2, %v1428_v36 }
 0x2a8   : > { %1494 = vst.msk [vmem:[%s2154_s25 + $0xb0] sm:$0xff] %vm1471_vm2, %v1423_v38 }
 0x2ac   : > { %v1797_v39 = vpop.f32.mrb[24].mxu1 }
 0x2ad   : > { %v1438_v40 = vadd.f32 %v1797_v39, %v2147_v57  ;;  %v1432_v41 = vpop.f32.mrb[25].mxu1 }
 0x2ae   : > { %v1433_v44 = vadd.f32 %v2147_v57, %v1432_v41 }
 0x2af   : > { %1497 = vst.msk [vmem:[%s2154_s25 + $0xc8] sm:$0xff] %vm1471_vm2, %v1438_v40 }
 0x2b0   : > { %1496 = vst.msk [vmem:[%s2154_s25 + $0xc0] sm:$0xff] %vm1471_vm2, %v1433_v44 }
 0x2b4   : > { %v1800_v45 = vpop.f32.mrb[26].mxu1 }
 0x2b5   : > { %v1448_v46 = vadd.f32 %v1800_v45, %v2147_v57  ;;  %v1442_v47 = vpop.f32.mrb[27].mxu1 }
 0x2b6   : > { %v1443_v48 = vadd.f32 %v2147_v57, %v1442_v47 }
 0x2b7   : > { %1499 = vst.msk [vmem:[%s2154_s25 + $0xd8] sm:$0xff] %vm1471_vm2, %v1448_v46 }
 0x2b8   : > { %1498 = vst.msk [vmem:[%s2154_s25 + $0xd0] sm:$0xff] %vm1471_vm2, %v1443_v48 }
 0x2bc   : > { %v1803_v49 = vpop.f32.mrb[28].mxu1 }
 0x2bd   : > { %v1458_v51 = vadd.f32 %v1803_v49, %v2147_v57  ;;  %v1452_v52 = vpop.f32.mrb[29].mxu1 }
 0x2be   : > { %v1453_v53 = vadd.f32 %v2147_v57, %v1452_v52 }
 0x2bf   : > { %1501 = vst.msk [vmem:[%s2154_s25 + $0xe8] sm:$0xff] %vm1471_vm2, %v1458_v51 }
 0x2c0   : > { %1500 = vst.msk [vmem:[%s2154_s25 + $0xe0] sm:$0xff] %vm1471_vm2, %v1453_v53 }
 0x2c4   : > { %v1806_v54 = vpop.f32.mrb[30].mxu1 }
 0x2c5   : > { %v1468_v55 = vadd.f32 %v1806_v54, %v2147_v57  ;;  %v1462_v56 = vpop.f32.mrb[31].mxu1 }
 0x2c6   : > { %v1463_v43 = vadd.f32 %v2147_v57, %v1462_v56 }
 0x2c7   : > { %1503 = vst.msk [vmem:[%s2154_s25 + $0xf8] sm:$0xff] %vm1471_vm2, %v1468_v55 }
 0x2c8   : > { %1502 = vst.msk [vmem:[%s2154_s25 + $0xf0] sm:$0xff] %vm1471_vm2, %v1463_v43 }
 0x2c9 PF: > { %s17_s24 = sadd.s32 1, %s1832_s24  }
 0x2ca   : > { %p14_p4 = scmp.ge.s32.totalorder %s17_s24, 6  }
 0x2cc   :  { %16 = sbr.rel (!%p14_p4) target bundleno = 1 (0x1), region = 78 }

</bundles_post_ra>
